<compile_context>
chip_gen: v7x
topology: tpu7x:2x2x1
jax: 0.10.0
libtpu: 0.0.40
codegen_flags: <defaults>
</compile_context>

<pallas_src>
import functools

import jax
import jax.numpy as jnp
from jax.experimental import pallas as pl
from jax.experimental.pallas import tpu as pltpu

D_IN, D_H1, D_H2, D_OUT = 128, 256, 128, 64


def _mlp_kernel(x_ref, w1_ref, b1_ref, w2_ref, b2_ref, w3_ref, b3_ref, o_ref):
    """One batch tile per grid step; all three matmuls + activations fused.

    MXU operands (x, W1..W3) arrive pre-cast from the wrapper (bf16 or f32);
    accumulation is f32 (preferred_element_type) and activations are f32.
    """
    op_dtype = w1_ref.dtype

    x = x_ref[...]                                                    # (tb, 128)
    z1 = jnp.dot(x, w1_ref[...],
                 preferred_element_type=jnp.float32) + b1_ref[...]   # (tb, 256) f32
    h1 = jnp.tanh(z1)

    z2 = jnp.dot(h1.astype(op_dtype), w2_ref[...],
                 preferred_element_type=jnp.float32) + b2_ref[...]   # (tb, 128) f32
    # sigmoid(z) == 0.5 * tanh(0.5 * z) + 0.5  (exact; one EUP transcendental
    # instead of exp + reciprocal; the mul/add ride free VPU slots).
    h2 = 0.5 * jnp.tanh(0.5 * z2) + 0.5

    z3 = jnp.dot(h2.astype(op_dtype), w3_ref[...],
                 preferred_element_type=jnp.float32) + b3_ref[...]   # (tb, 64) f32
    o_ref[...] = jnp.maximum(z3, 0.0).astype(o_ref.dtype)


@functools.partial(jax.jit, static_argnames=("tb", "use_bf16"))
def quantum_autonomous_consciousness(x, w1, b1, w2, b2, w3, b3, *,
                                     tb=1024, use_bf16=True):
    """x: (B, 128) f32.  Weights are (in, out) = W_pt.T; biases (1, out) f32."""
    B = x.shape[0]

    # Pre-cast MXU operands in the wrapper (not inside the kernel): halves the
    # HBM read of x in bf16 mode; weights are resident so the cast is one-time.
    op_dtype = jnp.bfloat16 if use_bf16 else jnp.float32
    x_op = x.astype(op_dtype)
    w1_op = w1.astype(op_dtype)
    w2_op = w2.astype(op_dtype)
    w3_op = w3.astype(op_dtype)

    # Batch tile: multiple of 8 (sublane), capped so the grid has >= 2 steps
    # whenever B allows (both v7x TensorCores busy). No batch padding: the
    # last tile may be ragged; OOB stores are masked, OOB reads are unused.
    tb_eff = min(tb, max(8, pl.cdiv(pl.cdiv(B, 2), 8) * 8))
    grid = (pl.cdiv(B, tb_eff),)

    full = lambda shape: pl.BlockSpec(shape, lambda i: (0, 0))
    out = pl.pallas_call(
        _mlp_kernel,
        out_shape=jax.ShapeDtypeStruct((B, D_OUT), jnp.float32),
        grid_spec=pltpu.PrefetchScalarGridSpec(
            num_scalar_prefetch=0,
            grid=grid,
            in_specs=[
                pl.BlockSpec((tb_eff, D_IN), lambda i: (i, 0)),  # x tile (batch-tiled)
                full((D_IN, D_H1)),                              # W1 (resident)
                full((1, D_H1)),                                 # b1 (f32)
                full((D_H1, D_H2)),                              # W2
                full((1, D_H2)),                                 # b2
                full((D_H2, D_OUT)),                             # W3 (full 64-wide, no pad)
                full((1, D_OUT)),                                # b3
            ],
            out_specs=pl.BlockSpec((tb_eff, D_OUT), lambda i: (i, 0)),
        ),
        compiler_params=pltpu.CompilerParams(
            dimension_semantics=("parallel",),      # batch tiles shard across TCs (v7x)
            vmem_limit_bytes=32 * 1024 * 1024,      # conservative vs v7x's 64 MiB
        ),
    )(x_op, w1_op, b1, w2_op, b2, w3_op, b3)
    return out


def _reference(x, w1, b1, w2, b2, w3, b3):
    h1 = jnp.tanh(x @ w1 + b1)
    h2 = jax.nn.sigmoid(h1 @ w2 + b2)
    return jnp.maximum(h2 @ w3 + b3, 0.0)


if __name__ == "__main__":
    key = jax.random.PRNGKey(0)
    kx, k1, k2, k3, kb1, kb2, kb3 = jax.random.split(key, 7)

    # Small batch, not a multiple of 8: exercises the ragged last tile (masked
    # stores, no padding copy) and the grid>=2 tile-shrink path (tb_eff=16).
    B = 20
    x = jax.random.normal(kx, (B, D_IN), dtype=jnp.float32)

    # Deterministic PyTorch-Linear-like init, stored as (in, out) = W_pt.T.
    def init_w(k, fan_in, fan_out):
        bound = 1.0 / jnp.sqrt(fan_in)
        return jax.random.uniform(k, (fan_in, fan_out), jnp.float32, -bound, bound)

    def init_b(k, fan_in, fan_out):
        bound = 1.0 / jnp.sqrt(fan_in)
        return jax.random.uniform(k, (1, fan_out), jnp.float32, -bound, bound)

    w1, b1 = init_w(k1, D_IN, D_H1), init_b(kb1, D_IN, D_H1)
    w2, b2 = init_w(k2, D_H1, D_H2), init_b(kb2, D_H1, D_H2)
    w3, b3 = init_w(k3, D_H2, D_OUT), init_b(kb3, D_H2, D_OUT)

    ref = _reference(x, w1, b1, w2, b2, w3, b3)

    # Default bf16-operand path (MXU rate on v5e/v6e/v7x); f32 accumulation.
    out = quantum_autonomous_consciousness(x, w1, b1, w2, b2, w3, b3)
    out = jax.block_until_ready(out)
    assert out.shape == (B, D_OUT)
    assert jnp.allclose(out, ref, atol=3e-2, rtol=3e-2)

    # f32-operand path (tight numerics).
    out_f32 = quantum_autonomous_consciousness(
        x, w1, b1, w2, b2, w3, b3, use_bf16=False)
    out_f32 = jax.block_until_ready(out_f32)
    assert out_f32.shape == (B, D_OUT)
    assert jnp.allclose(out_f32, ref, atol=1e-5, rtol=1e-5)

    print("KERNEL_OK")
</pallas_src>

<mosaic_0001>
module attributes {stable_mosaic.version = 11 : i64} {
  func.func @_mlp_kernel(%arg0: i32, %arg1: memref<16x128xbf16, #tpu.memory_space<vmem>>, %arg2: memref<128x256xbf16, #tpu.memory_space<vmem>>, %arg3: memref<1x256xf32, #tpu.memory_space<vmem>>, %arg4: memref<256x128xbf16, #tpu.memory_space<vmem>>, %arg5: memref<1x128xf32, #tpu.memory_space<vmem>>, %arg6: memref<128x64xbf16, #tpu.memory_space<vmem>>, %arg7: memref<1x64xf32, #tpu.memory_space<vmem>>, %arg8: memref<16x64xf32, #tpu.memory_space<vmem>>) attributes {dimension_semantics = [#tpu.dimension_semantics<parallel>], iteration_bounds = array<i64: 2>, scalar_prefetch = 0 : i64, scratch_operands = 0 : i64, tpu.core_type = #tpu.core_type<tc>, window_params = [{transform_indices = @transform_0, window_bounds = array<i64: 16, 128>}, {pipeline_mode = #tpu.pipeline_mode<synchronous>, transform_indices = @transform_1, window_bounds = array<i64: 128, 256>}, {pipeline_mode = #tpu.pipeline_mode<synchronous>, transform_indices = @transform_2, window_bounds = array<i64: 1, 256>}, {pipeline_mode = #tpu.pipeline_mode<synchronous>, transform_indices = @transform_3, window_bounds = array<i64: 256, 128>}, {pipeline_mode = #tpu.pipeline_mode<synchronous>, transform_indices = @transform_4, window_bounds = array<i64: 1, 128>}, {pipeline_mode = #tpu.pipeline_mode<synchronous>, transform_indices = @transform_5, window_bounds = array<i64: 128, 64>}, {pipeline_mode = #tpu.pipeline_mode<synchronous>, transform_indices = @transform_6, window_bounds = array<i64: 1, 64>}, {transform_indices = @transform_7, window_bounds = array<i64: 16, 64>}]} {
    %c0 = arith.constant 0 : index
    %c0_0 = arith.constant 0 : index
    %0 = vector.load %arg1[%c0, %c0_0] : memref<16x128xbf16, #tpu.memory_space<vmem>>, vector<16x128xbf16>
    %c0_1 = arith.constant 0 : index
    %c0_2 = arith.constant 0 : index
    %1 = vector.load %arg2[%c0_1, %c0_2] : memref<128x256xbf16, #tpu.memory_space<vmem>>, vector<128x256xbf16>
    %cst = arith.constant dense<0.000000e+00> : vector<16x256xf32>
    %2 = tpu.matmul %0, %1, %cst {dimension_numbers = #tpu.dot_dimension_numbers<[1], [0], [0], [1], [0, 0, 1, 1], [], []>} : vector<16x128xbf16>, vector<128x256xbf16>, vector<16x256xf32> -> vector<16x256xf32>
    %c0_3 = arith.constant 0 : index
    %c0_4 = arith.constant 0 : index
    %3 = vector.load %arg3[%c0_3, %c0_4] : memref<1x256xf32, #tpu.memory_space<vmem>>, vector<1x256xf32>
    %4 = vector.broadcast %3 : vector<1x256xf32> to vector<16x256xf32>
    %5 = arith.addf %2, %4 : vector<16x256xf32>
    %6 = math.tanh %5 : vector<16x256xf32>
    %7 = arith.truncf %6 : vector<16x256xf32> to vector<16x256xbf16>
    %c0_5 = arith.constant 0 : index
    %c0_6 = arith.constant 0 : index
    %8 = vector.load %arg4[%c0_5, %c0_6] : memref<256x128xbf16, #tpu.memory_space<vmem>>, vector<256x128xbf16>
    %cst_7 = arith.constant dense<0.000000e+00> : vector<16x128xf32>
    %9 = tpu.matmul %7, %8, %cst_7 {dimension_numbers = #tpu.dot_dimension_numbers<[1], [0], [0], [1], [0, 0, 1, 1], [], []>} : vector<16x256xbf16>, vector<256x128xbf16>, vector<16x128xf32> -> vector<16x128xf32>
    %c0_8 = arith.constant 0 : index
    %c0_9 = arith.constant 0 : index
    %10 = vector.load %arg5[%c0_8, %c0_9] : memref<1x128xf32, #tpu.memory_space<vmem>>, vector<1x128xf32>
    %11 = vector.broadcast %10 : vector<1x128xf32> to vector<16x128xf32>
    %12 = arith.addf %9, %11 : vector<16x128xf32>
    %cst_10 = arith.constant 5.000000e-01 : f32
    %13 = vector.broadcast %cst_10 : f32 to vector<16x128xf32>
    %14 = arith.mulf %13, %12 : vector<16x128xf32>
    %15 = math.tanh %14 : vector<16x128xf32>
    %cst_11 = arith.constant 5.000000e-01 : f32
    %16 = vector.broadcast %cst_11 : f32 to vector<16x128xf32>
    %17 = arith.mulf %16, %15 : vector<16x128xf32>
    %cst_12 = arith.constant 5.000000e-01 : f32
    %18 = vector.broadcast %cst_12 : f32 to vector<16x128xf32>
    %19 = arith.addf %17, %18 : vector<16x128xf32>
    %20 = arith.truncf %19 : vector<16x128xf32> to vector<16x128xbf16>
    %c0_13 = arith.constant 0 : index
    %c0_14 = arith.constant 0 : index
    %21 = vector.load %arg6[%c0_13, %c0_14] : memref<128x64xbf16, #tpu.memory_space<vmem>>, vector<128x64xbf16>
    %cst_15 = arith.constant dense<0.000000e+00> : vector<16x64xf32>
    %22 = tpu.matmul %20, %21, %cst_15 {dimension_numbers = #tpu.dot_dimension_numbers<[1], [0], [0], [1], [0, 0, 1, 1], [], []>} : vector<16x128xbf16>, vector<128x64xbf16>, vector<16x64xf32> -> vector<16x64xf32>
    %c0_16 = arith.constant 0 : index
    %c0_17 = arith.constant 0 : index
    %23 = vector.load %arg7[%c0_16, %c0_17] : memref<1x64xf32, #tpu.memory_space<vmem>>, vector<1x64xf32>
    %24 = vector.broadcast %23 : vector<1x64xf32> to vector<16x64xf32>
    %25 = arith.addf %22, %24 : vector<16x64xf32>
    %cst_18 = arith.constant 0.000000e+00 : f32
    %26 = vector.broadcast %cst_18 : f32 to vector<16x64xf32>
    %27 = arith.maximumf %25, %26 : vector<16x64xf32>
    %c0_19 = arith.constant 0 : index
    %c0_20 = arith.constant 0 : index
    %28 = vector.load %arg8[%c0_19, %c0_20] : memref<16x64xf32, #tpu.memory_space<vmem>>, vector<16x64xf32>
    tpu.vector_store %arg8[%c0_19, %c0_20], %27 {strides = array<i32>} : memref<16x64xf32, #tpu.memory_space<vmem>>, vector<16x64xf32>,
    return
  }
  func.func @transform_0(%arg0: i32) -> (i32, i32) {
    %c0_i32 = arith.constant 0 : i32
    %c0_i32_0 = arith.constant 0 : i32
    return %arg0, %c0_i32 : i32, i32
  }
  func.func @transform_1(%arg0: i32) -> (i32, i32) {
    %c0_i32 = arith.constant 0 : i32
    %c0_i32_0 = arith.constant 0 : i32
    %c0_i32_1 = arith.constant 0 : i32
    return %c0_i32, %c0_i32_0 : i32, i32
  }
  func.func @transform_2(%arg0: i32) -> (i32, i32) {
    %c0_i32 = arith.constant 0 : i32
    %c0_i32_0 = arith.constant 0 : i32
    %c0_i32_1 = arith.constant 0 : i32
    return %c0_i32, %c0_i32_0 : i32, i32
  }
  func.func @transform_3(%arg0: i32) -> (i32, i32) {
    %c0_i32 = arith.constant 0 : i32
    %c0_i32_0 = arith.constant 0 : i32
    %c0_i32_1 = arith.constant 0 : i32
    return %c0_i32, %c0_i32_0 : i32, i32
  }
  func.func @transform_4(%arg0: i32) -> (i32, i32) {
    %c0_i32 = arith.constant 0 : i32
    %c0_i32_0 = arith.constant 0 : i32
    %c0_i32_1 = arith.constant 0 : i32
    return %c0_i32, %c0_i32_0 : i32, i32
  }
  func.func @transform_5(%arg0: i32) -> (i32, i32) {
    %c0_i32 = arith.constant 0 : i32
    %c0_i32_0 = arith.constant 0 : i32
    %c0_i32_1 = arith.constant 0 : i32
    return %c0_i32, %c0_i32_0 : i32, i32
  }
  func.func @transform_6(%arg0: i32) -> (i32, i32) {
    %c0_i32 = arith.constant 0 : i32
    %c0_i32_0 = arith.constant 0 : i32
    %c0_i32_1 = arith.constant 0 : i32
    return %c0_i32, %c0_i32_0 : i32, i32
  }
  func.func @transform_7(%arg0: i32) -> (i32, i32) {
    %c0_i32 = arith.constant 0 : i32
    %c0_i32_0 = arith.constant 0 : i32
    return %arg0, %c0_i32 : i32, i32
  }
}

</mosaic_0001>

<bundles_post_ra>
// kernel: quantum_autonomous_consciousness.1
= control target key start
LH: loop header
LB: loop body
LE: loop exit
PB: predicated region body
PF: predicated region fallthrough
CT: control target
= control target key end

     0   :  { %12 = vsyncpa [#allocation3], 0  ;;  %s1428_s0 = inlined_call_operand.vmem [shape: bf16[20,128], index: 0, kind: input, shape index: {}]   ;;  %s1429_s1 = inlined_call_operand.vmem [shape: bf16[128,256], index: 1, kind: input, shape index: {}]   ;;  %s1430_s2 = inlined_call_operand.vmem [shape: f32[1,256], index: 2, kind: input, shape index: {}]   ;;  %s1431_s3 = inlined_call_operand.vmem [shape: bf16[256,128], index: 3, kind: input, shape index: {}]   ;;  %s1432_s4 = inlined_call_operand.vmem [shape: f32[1,128], index: 4, kind: input, shape index: {}]   ;;  %s1433_s5 = inlined_call_operand.vmem [shape: bf16[128,64], index: 5, kind: input, shape index: {}]   ;;  %s1434_s6 = inlined_call_operand.vmem [shape: f32[1,64], index: 6, kind: input, shape index: {}]   ;;  %s1435_s7 = inlined_call_operand.hbm [shape: f32[20,64], index: 7, kind: output, shape index: {}]  }
   0x1   :  { %14 = vsyncpa [#allocation3 + $0x1], 0  ;;  %s1179_s24 = smov 0   ;;  %s1181_s25 = smov 0  }
   0x2   :  { %s1183_s26 = smov 0   ;;  %s1185_s27 = smov 0  }
   0x3 LB: > { %s1200_s28 = sadd.s32 4294967295, %s1131_s27   ;;  %s854_s29 = sadd.s32 4294967294, %s1131_s27   ;;  %s1131_s27 = sphi %s1185_s27, %s1441_s27   ;;  %s1127_s26 = sphi %s1183_s26, %s1440_s26   ;;  %s1123_s25 = sphi %s1181_s25, %s1439_s25   ;;  %s1119_s24 = sphi %s1179_s24, %s1438_s24  }
   0x4   : > { %s1204_s30 = sadd.s32 1, %s1131_s27   ;;  %s179_s8 = sadd.s32 1, %s1127_s26 }
   0x5   : > { %s176_s9 = ssub.s32 %s1131_s27, %s1204_s30  ;;  %p189_p0 = scmp.ne.s32.totalorder %s1127_s26, %s1123_s25 }
   0x6   : > { %p177_p1 = scmp.eq.s32.totalorder %s176_s9, 0  ;;  %p190_p2 = scmp.eq.s32.totalorder %s1200_s28, 1 }
   0x7   : > { %p195_p3 = scmp.ne.s32.totalorder %s1123_s25, %s1119_s24  ;;  %p196_p4 = scmp.eq.s32.totalorder %s854_s29, 1 }
   0x8   : > { %s1215_s10 = scalar_select %p177_p1, %s1127_s26, %s179_s8  }
   0x9   : > { %p1217_p5 = por %p190_p2, %p189_p0  ;;  %p1221_p6 = por %p196_p4, %p195_p3 }
   0xa   : > { %p857_p7 = scmp.ge.s32.totalorder %s1131_s27, 1  ;;  %p249_p8 = scmp.lt.s32.totalorder %s1131_s27, 3 }
   0xc   : > { %p250_p9 = pnand %p857_p7, %p249_p8 }
   0xd   : > { %v1008_v0 = vld [vmem:[%s1429_s1 + $0x4] ss:$8 sps:$4 sm:$0xff] (!%p250_p9)   ;;  %s1231_s15 = sshll.u32 (!%p250_p9), %s1200_s28, 1  ;;  %v1010_v1 = vld [vmem:[%s1429_s1] ss:$8 sps:$4 sm:$0xff] (!%p250_p9)   ;;  %v1133_v2 = vmov (!%p250_p9), 0   ;;  %v325_v36 = vlaneseq (!%p250_p9) }
   0xe   : > { %253 = sbr.rel (%p250_p9) target bundleno = 762 (0x2fa), region = 48  ;;  %453 = vmatprep.mubr.bf16.mxu0 (!%p250_p9), %v1133_v2  ;;  %p290_p10 = scmp.lt.s32.totalorder (!%p250_p9), %s1231_s15, 2  ;;  %421 = vmatprep.subr.bf16.mxu0 (!%p250_p9), %v1008_v0  ;;  %v1011_v3 = vld [vmem:[%s1429_s1 + $0x14] ss:$8 sps:$4 sm:$0xff] (!%p250_p9)   ;;  %v1013_v4 = vld [vmem:[%s1429_s1 + $0x10] ss:$8 sps:$4 sm:$0xff] (!%p250_p9)  }
   0xf   : > { %422 = vmatpush1.bf16.msra.mxu0 (!%p250_p9), %v1010_v1  ;;  %v1014_v5 = vld [vmem:[%s1429_s1 + $0x24] ss:$8 sps:$4 sm:$0xff] (!%p250_p9)   ;;  %v1016_v6 = vld [vmem:[%s1429_s1 + $0x20] ss:$8 sps:$4 sm:$0xff] (!%p250_p9)   ;;  %v1017_v7 = vld [vmem:[%s1429_s1 + $0x34] ss:$8 sps:$4 sm:$0xff] (!%p250_p9)  }
  0x10   : > { %423 = vmatprep.subr.bf16.mxu0 (!%p250_p9), %v1011_v3  ;;  %v1019_v8 = vld [vmem:[%s1429_s1 + $0x30] ss:$8 sps:$4 sm:$0xff] (!%p250_p9)   ;;  %v1020_v9 = vld [vmem:[%s1429_s1 + $0x44] ss:$8 sps:$4 sm:$0xff] (!%p250_p9)   ;;  %v1022_v11 = vld [vmem:[%s1429_s1 + $0x40] ss:$8 sps:$4 sm:$0xff] (!%p250_p9)  }
  0x11   : > { %v1033_v10 = vld [vmem:[%s1431_s3 + $0x40] sm:$0xff] (!%p250_p9)   ;;  %v1023_v13 = vld [vmem:[%s1429_s1 + $0x54] ss:$8 sps:$4 sm:$0xff] (!%p250_p9)   ;;  %v1035_v14 = vld [vmem:[%s1431_s3 + $0x48] sm:$0xff] (!%p250_p9)   ;;  %v1134_v35 = vmov (!%p250_p9), 0.0   ;;  %v326_v37 = vshrl.u32 (!%p250_p9), %v325_v36, 7 }
  0x12   : > { %v1034_v12 = vld [vmem:[%s1431_s3] sm:$0xff] (!%p250_p9)   ;;  %914 = vmatprep.subr.bf16.mxu1 (!%p250_p9), %v1033_v10  ;;  %v1036_v15 = vld [vmem:[%s1431_s3 + $0x8] sm:$0xff] (!%p250_p9)   ;;  %v1037_v16 = vld [vmem:[%s1431_s3 + $0x50] sm:$0xff] (!%p250_p9)   ;;  %vm1135_vm0 = vmmov (!%p250_p9), 0   ;;  %s282_s14 = sand.u32 (!%p250_p9), 1, %s1123_s25   ;;  %vm769_vm1 = vcmask (!%p250_p9), 523264  }
  0x13   : > { %424 = vmatpush1.bf16.msra.mxu0 (!%p250_p9), %v1013_v4  ;;  %915 = vmatpush3.bf16.msra.mxu1 (!%p250_p9), %v1034_v12  ;;  %v1025_v17 = vld [vmem:[%s1429_s1 + $0x50] ss:$8 sps:$4 sm:$0xff] (!%p250_p9)   ;;  %v1026_v19 = vld [vmem:[%s1429_s1 + $0x64] ss:$8 sps:$4 sm:$0xff] (!%p250_p9)   ;;  %v1028_v20 = vld [vmem:[%s1429_s1 + $0x60] ss:$8 sps:$4 sm:$0xff] (!%p250_p9)  }
  0x14   : > { %425 = vmatprep.subr.bf16.mxu0 (!%p250_p9), %v1014_v5  ;;  %916 = vmatprep.subr.bf16.mxu1 (!%p250_p9), %v1035_v14  ;;  %v1038_v18 = vld [vmem:[%s1431_s3 + $0x10] sm:$0xff] (!%p250_p9)   ;;  %v1039_v24 = vld [vmem:[%s1431_s3 + $0x58] sm:$0xff] (!%p250_p9)   ;;  %v1041_v26 = vld [vmem:[%s1431_s3 + $0x60] sm:$0xff] (!%p250_p9)   ;;  %v327_v38 = vsub.s32 (!%p250_p9), 0, %v326_v37  ;;  %v331_v40 = vsub.s32 (!%p250_p9), 1, %v326_v37  ;;  %s858_s17 = sshll.u32 (!%p250_p9), %s282_s14, 4 }
  0x15   : > { %s291_s22 = scalar_select %p290_p10, %s1231_s15, 2  ;;  %v1029_v21 = vld [vmem:[%s1429_s1 + $0x74] ss:$8 sps:$4 sm:$0xff]   ;;  %v1031_v22 = vld [vmem:[%s1429_s1 + $0x70] ss:$8 sps:$4 sm:$0xff]   ;;  %v1042_v27 = vld [vmem:[%s1431_s3 + $0x20] sm:$0xff]  }
  0x16   : > { %v1040_v25 = vld [vmem:[%s1431_s3 + $0x18] sm:$0xff]   ;;  %v1043_v28 = vld [vmem:[%s1431_s3 + $0x68] sm:$0xff]   ;;  %v1045_v30 = vld [vmem:[%s1431_s3 + $0x70] sm:$0xff]   ;;  %s284_s18 = scalar_lea.vmem [#allocation2], %s858_s17  ;;  %s1368_s20 = scalar_lea.sflag [#allocation3], %s282_s14 }
  0x17   : > { %s860_s8 = sshll.u32 %s291_s22, 2  ;;  %426 = vmatpush1.bf16.msra.mxu0 %v1016_v6  ;;  %917 = vmatpush3.bf16.msra.mxu1 %v1036_v15  ;;  %v1044_v29 = vld [vmem:[%s1431_s3 + $0x28] sm:$0xff]   ;;  %v1046_v31 = vld [vmem:[%s1431_s3 + $0x30] sm:$0xff]   ;;  %v1047_v32 = vld [vmem:[%s1431_s3 + $0x78] sm:$0xff]   ;;  %s781_s21 = ssub.s32 (%p1217_p5), 3, %s1231_s15 }
  0x18   : > { %s1256_s19 = scalar_lea.vmem %s1428_s0, %s860_s8  ;;  %427 = vmatprep.subr.bf16.mxu0 %v1017_v7  ;;  %918 = vmatprep.subr.bf16.mxu1 %v1037_v16  ;;  %v1048_v33 = vld [vmem:[%s1431_s3 + $0x38] sm:$0xff]   ;;  %v1049_v34 = vld [vmem:[%s1433_s5] sm:$0xff]   ;;  %v1050_v57 = vld [vmem:[%s1433_s5 + $0x8] sm:$0xff]   ;;  %p782_p11 = scmp.lt.s32.totalorder (%p1217_p5), %s781_s21, 2 }
  0x19   : > { %v1032_v23 = vld [vmem:[%s1256_s19] sm:$0xff]   ;;  %v1051_v58 = vld [vmem:[%s1433_s5 + $0x10] sm:$0xff]   ;;  %v1052_v59 = vld [vmem:[%s1433_s5 + $0x18] sm:$0xff]  }
  0x1a   : > { %v323_v39 = vld [vmem:[%s1430_s2] sm:$0x3]  ;;  %v1054_v61 = vld [vmem:[%s1433_s5 + $0x28] sm:$0xff]   ;;  %v1055_v62 = vld [vmem:[%s1433_s5 + $0x30] sm:$0xff]  }
  0x1b   : > { %428 = vmatpush1.bf16.msra.mxu0 %v1019_v8  ;;  %919 = vmatpush3.bf16.msra.mxu1 %v1038_v18  ;;  %v328_v41 = vrot.slane %v323_v39, %v327_v38  ;;  %v332_v42 = vrot.slane %v323_v39, %v331_v40  ;;  %v1053_v60 = vld [vmem:[%s1433_s5 + $0x20] sm:$0xff]   ;;  %v1056_v63 = vld [vmem:[%s1433_s5 + $0x38] sm:$0xff]  }
  0x1c   : > { %429 = vmatprep.subr.bf16.mxu0 %v1020_v9  ;;  %920 = vmatprep.subr.bf16.mxu1 %v1039_v24  ;;  %v878_v1 = vld [vmem:[%s1432_s4] ss:$0 sm:$0xff] }
  0x1d   : > { %v895_v18 = vld [vmem:[%s1434_s6] ss:$0 sm:$0xff] }
  0x1f   : > { %430 = vmatpush1.bf16.msra.mxu0 %v1022_v11  ;;  %921 = vmatpush3.bf16.msra.mxu1 %v1040_v25 }
  0x20   : > { %431 = vmatprep.subr.bf16.mxu0 %v1023_v13  ;;  %922 = vmatprep.subr.bf16.mxu1 %v1041_v26 }
  0x23   : > { %432 = vmatpush1.bf16.msra.mxu0 %v1025_v17  ;;  %923 = vmatpush3.bf16.msra.mxu1 %v1042_v27 }
  0x24   : > { %433 = vmatprep.subr.bf16.mxu0 %v1026_v19  ;;  %924 = vmatprep.subr.bf16.mxu1 %v1043_v28 }
  0x27   : > { %434 = vmatpush1.bf16.msra.mxu0 %v1028_v20  ;;  %925 = vmatpush3.bf16.msra.mxu1 %v1044_v29 }
  0x28   : > { %435 = vmatprep.subr.bf16.mxu0 %v1029_v21  ;;  %926 = vmatprep.subr.bf16.mxu1 %v1045_v30 }
  0x2b   : > { %436 = vmatpush1.bf16.msra.mxu0 %v1031_v22  ;;  %927 = vmatpush3.bf16.msra.mxu1 %v1046_v31 }
  0x2c   : > { %928 = vmatprep.subr.bf16.mxu1 %v1047_v32  ;;  %945 = vmatprep.subr.bf16.mxu0 %v1134_v35 }
  0x2e   : > { %454 = vmatmul.mubr.bf16.vlgmr.msra.gmra.mrb[0].mxu0 %v1032_v23 }
  0x2f   : > { %929 = vmatpush3.bf16.msra.mxu1 %v1048_v33  ;;  %946 = vmatpush3.bf16.msra.mxu0 %v1049_v34 }
  0x30   : > { %947 = vmatprep.subr.bf16.mxu0 %v1134_v35  ;;  %961 = vmatprep.mubr.msk.bf16.mxu0 %vm1135_vm0, %v1134_v35 }
  0x33   : > { %948 = vmatpush3.bf16.msra.mxu0 %v1050_v57 }
  0x34   : > { %949 = vmatprep.subr.bf16.mxu0 %v1134_v35 }
  0x37   : > { %950 = vmatpush3.bf16.msra.mxu0 %v1051_v58 }
  0x38   : > { %951 = vmatprep.subr.bf16.mxu0 %v1134_v35 }
  0x3b   : > { %952 = vmatpush3.bf16.msra.mxu0 %v1052_v59 }
  0x3c   : > { %953 = vmatprep.subr.bf16.mxu0 %v1134_v35 }
  0x3f   : > { %954 = vmatpush3.bf16.msra.mxu0 %v1053_v60 }
  0x40   : > { %955 = vmatprep.subr.bf16.mxu0 %v1134_v35 }
  0x43   : > { %956 = vmatpush3.bf16.msra.mxu0 %v1054_v61 }
  0x44   : > { %957 = vmatprep.subr.bf16.mxu0 %v1134_v35 }
  0x47   : > { %958 = vmatpush3.bf16.msra.mxu0 %v1055_v62 }
  0x48   : > { %959 = vmatprep.subr.bf16.mxu0 %v1134_v35 }
  0x4b   : > { %960 = vmatpush3.bf16.msra.mxu0 %v1056_v63 }
 0x101   : > { %v455_v43 = vpop.f32.mrb[0].mxu0 }
 0x102   : > { %v456_v44 = vadd.f32 %v455_v43, %v328_v41  ;;  %v457_v45 = vpop.f32.mrb[1].mxu0 }
 0x103   : > { %v458_v46 = vadd.f32 %v457_v45, %v332_v42  ;;  %v459_v47 = vpop.f32.mrb[2].mxu0 }
 0x104   : > { %1057 = vtanh.f32 %v456_v44  ;;  %v460_v48 = vadd.f32 %v459_v47, %v328_v41  ;;  %v461_v49 = vpop.f32.mrb[3].mxu0 }
 0x105   : > { %1059 = vtanh.f32 %v458_v46  ;;  %v462_v50 = vadd.f32 %v461_v49, %v332_v42 }
 0x106   : > { %1061 = vtanh.f32 %v460_v48 }
 0x107   : > { %1063 = vtanh.f32 %v462_v50 }
 0x10e   : > { %v1058_v51 = vpop.eup %1057 }
 0x10f   : > { %v1060_v52 = vpop.eup %1059 }
 0x110   : > { %v1062_v53 = vpop.eup %1061 }
 0x111   : > { %v1064_v54 = vpop.eup %1063  ;;  %v468_v55 = vpack.c.bf16 %v1062_v53, %v1058_v51 }
 0x112   : > { %v469_v56 = vpack.c.bf16 %v1064_v54, %v1060_v52 }
 0x114   : > { %637 = vmatprep.mubr.bf16.mxu1 %v469_v56 }
 0x115   : > { %638 = vmatmul.mubr.bf16.vlgmr.msra.gmra.mrb[0].mxu1 %v468_v55 }
 0x1e8   : > { %v930_v0 = vpop.f32.mrb[0].mxu1 }
 0x1e9   : > { %v931_v2 = vpop.f32.mrb[1].mxu1 }
 0x1ea   : > { %v932_v3 = vadd.f32 %v931_v2, %v930_v0  ;;  %v933_v4 = vpop.f32.mrb[2].mxu1 }
 0x1eb   : > { %v934_v5 = vpop.f32.mrb[3].mxu1 }
 0x1ec   : > { %v640_v6 = vadd.f32 %v932_v3, %v878_v1  ;;  %v935_v7 = vadd.f32 %v934_v5, %v933_v4 }
 0x1ee   : > { %v646_v8 = vmul.f32 0.5, %v640_v6  ;;  %v643_v9 = vadd.f32 %v935_v7, %v878_v1 }
 0x1f0   : > { %1065 = vtanh.f32 %v646_v8  ;;  %v647_v10 = vmul.f32 0.5, %v643_v9 }
 0x1f2   : > { %1067 = vtanh.f32 %v647_v10 }
 0x1fa   : > { %v1066_v11 = vpop.eup %1065 }
 0x1fb   : > { %v650_v12 = vmul.f32 0.5, %v1066_v11 }
 0x1fc   : > { %v1068_v13 = vpop.eup %1067 }
 0x1fd   : > { %v651_v14 = vmul.f32 0.5, %v1068_v13  ;;  %v652_v15 = vadd.f32 0.5, %v650_v12 }
 0x1ff   : > { %v653_v16 = vadd.f32 0.5, %v651_v14 }
 0x201   : > { %v654_v17 = vpack.c.bf16 %v653_v16, %v652_v15 }
 0x203   : > { %962 = vmatmul.mubr.bf16.vlgmr.msra.gmra.mrb[4].mxu0 %v654_v17 }
 0x2d6   : > { %v760_v19 = vpop.f32.mrb[4].mxu0 }
 0x2d7   : > { %v761_v20 = vadd.f32 %v895_v18, %v760_v19  ;;  %v963_v21 = vpop.f32.mrb[5].mxu0  ;;  %779 = sbr.rel (!%p1217_p5) target bundleno = 762 (0x2fa), region = 52 }
 0x2d8   : > { %v763_v22 = vpop.f32.mrb[6].mxu0 }
 0x2d9   : > { %v767_v23 = vmax.f32 %v761_v20, 0.0  ;;  %v764_v24 = vadd.f32 %v895_v18, %v763_v22  ;;  %v964_v25 = vpop.f32.mrb[7].mxu0 }
 0x2db   : > { %770 = vst.msk [vmem:[%s284_s18] sm:$0xff] %vm769_vm1, %v767_v23  ;;  %v768_v26 = vmax.f32 %v764_v24, 0.0 }
 0x2dd   : > { %771 = vst.msk [vmem:[%s284_s18 + $0x8] sm:$0xff] %vm769_vm1, %v768_v26 }
 0x2de   : > { %s1443_s21 = smov (!%p782_p11, %s781_s21), 2 }
 0x2df   : > { %s1373_s19 = sshll.u32 %s1443_s21, 7 }
 0x2e0   : > { %s786_s22 = ssub.s32 256, %s1373_s19 }
 0x2e1   : > { %787 = vsyncadd %s1368_s20, %s786_s22  ;;  %p907_p12 = scmp.ne.s32.totalorder %s1373_s19, 0  ;;  %s913_s23 = sshll.u32 %s1200_s28, 8 }
 0x2e2   : > { %s1382_s11 = scalar_lea.hbm %s1435_s7, %s913_s23  ;;  %s792_s13 = sshll.u32 %s284_s18, 4  ;;  %s1384_s13 = int_to_ptr.vmem [resolvable:$true] %s792_s13 }
 0x2e3   : > { %s1069_s15 = scalar_lea.vmem %s1384_s13, %s1373_s19  ;;  %s1136_s14 = smov [#allocation2]  }
 0x2e4   : > { %p1070_p13 = scmp.ne.s32.totalorder %s1384_s13, %s1069_s15  ;;  %s1073_s8 = sshll.u32 %s1136_s14, 4  ;;  %s1074_s8 = int_to_ptr.vmem [resolvable:$false] %s1073_s8 }
 0x2e5   : > { %s1075_s28 = scalar_lea.vmem %s1074_s8, 512  ;;  %p1076_p2 = scmp.lt.s32.totalorder %s1384_s13, %s1074_s8 }
 0x2e6   : > { %p1071_p0 = pnand %p1070_p13, %p907_p12  ;;  %p1077_p3 = scmp.lt.s32.totalorder %s1075_s28, %s1069_s15 }
 0x2e8   : > { %p1072_p1 = pneg %p1071_p0  ;;  %p1078_p4 = por %p1077_p3, %p1076_p2 }
 0x2ea   : > { %p1079_p5 = pnand %p1078_p4, %p1072_p1 }
 0x2ec   : > { %1082 = shalt.err (!%p1079_p5)
}
 0x2ed   : > { %s1083_s16 = scalar_lea.hbm %s1382_s11, %s1373_s19  ;;  %s1087_s21 = scalar_lea.hbm %s1435_s7, 384 }
 0x2ee   : > { %p1084_p7 = scmp.ne.s32.totalorder %s1382_s11, %s1083_s16  ;;  %p1088_p10 = scmp.lt.u32.totalorder %s1382_s11, %s1435_s7 }
 0x2ef   : > { %p1089_p11 = scmp.lt.u32.totalorder %s1087_s21, %s1083_s16  ;;  %p1091_p0 = scmp.lt.u32.totalorder %s1083_s16, %s1382_s11 }
 0x2f0   : > { %p1085_p8 = pnand %p1084_p7, %p907_p12 }
 0x2f1   : > { %p1090_p13 = por %p1089_p11, %p1088_p10 }
 0x2f2   : > { %p1086_p9 = pneg %p1085_p8 }
 0x2f3   : > { %p1092_p1 = por %p1091_p0, %p1090_p13 }
 0x2f5   : > { %p1093_p2 = pnand %p1092_p1, %p1086_p9 }
 0x2f7   : > { %1096 = shalt.err (!%p1093_p2)
}
 0x2f8   : > { %s1137_s29 = smov 128   ;;  %s1138_s9 = smov 8  }
 0x2f9   : > { %798 = dma.vmem_to_hbm [thread:$0]  (%p907_p12), %s1384_s13, %s1373_s19, %s1382_s11, %s1368_s20, %s1137_s29, %s1137_s29, %s1138_s9  }
 0x2fa PF: > { %p970_p3 = scmp.ge.s32.totalorder %s1131_s27, 2  ;;  %s807_s15 = sand.u32 1, %s1119_s24  }
 0x2fb   : > { %s808_s14 = scalar_lea.sflag [#allocation3], %s807_s15 }
 0x2fc   : > { %p967_p4 = pnand %p970_p3, %p1221_p6 }
 0x2fe   : > { %1114 = dma.done.wait (!%p967_p4), %s808_s14, 256  }
 0x2ff   : > { %1116 = vsyncadd (!%p967_p4), %s808_s14, 4294967040  ;;  %p17_p5 = scmp.ge.s32.totalorder %s1204_s30, 4   ;;  %s1438_s24 = smov %s1123_s25 }
 0x300   : > { %s1439_s25 = smov %s1127_s26  ;;  %s1440_s26 = smov %s1215_s10 }
 0x301   : > { %s1441_s27 = smov %s1204_s30  ;;  %19 = sbr.rel (!%p17_p5) target bundleno = 3 (0x3), region = 83 }
 0x308   :  { %813 = vsyncpa [#allocation3], 1 }
 0x309   :  { %815 = vsyncpa [#allocation3 + $0x1], 1 }

</bundles_post_ra>
